<compile_context>
chip_gen: v5e
topology: v5e:2x2
jax: 0.10.0
libtpu: 0.0.40
codegen_flags: <defaults>
</compile_context>

<pallas_src>
import functools

import jax
import jax.numpy as jnp
from jax import lax
from jax.experimental import pallas as pl
from jax.experimental.pallas import tpu as pltpu


def _focal_loss_kernel(x_ref, t_ref, o_ref, *, gamma, hw, tl, num_inner, ragged):
    h = pl.program_id(1)          # megacore split index
    l = pl.program_id(2)          # pixel-tile index within the split

    @pl.when(l == 0)
    def _():
        o_ref[...] = jnp.zeros_like(o_ref)

    x = x_ref[...].astype(jnp.float32)          # (1, C, TL) logits
    t = t_ref[...].astype(jnp.int32)            # (1, 1, TL) targets

    # Numerically stable log-softmax pieces along the class (sublane) axis.
    m = jnp.max(x, axis=1, keepdims=True)                  # (1, 1, TL)
    xm = x - m
    sum_e = jnp.sum(jnp.exp(xm), axis=1, keepdims=True)    # (1, 1, TL)

    # gather(dim=1, targets): select-then-reduce (no f32 one-hot, no 2nd pass).
    C = x.shape[1]
    ch = lax.broadcasted_iota(jnp.int32, (1, C, 1), 1)     # tiny; broadcasts over lanes
    xm_t = jnp.sum(jnp.where(ch == t, xm, 0.0), axis=1, keepdims=True)  # x_t - m

    log_pt = xm_t - jnp.log(sum_e)                         # (1, 1, TL)
    pt = jnp.exp(log_pt)                                   # (1, 1, TL) -> EUP slot

    one_minus_pt = 1.0 - pt
    g = float(gamma)
    if g == int(g) and 0 <= int(g) <= 4:                   # avoid pow (exp+log on EUP)
        gi = int(g)
        if gi == 0:
            mod = jnp.ones_like(one_minus_pt)
        else:
            mod = one_minus_pt
            for _ in range(gi - 1):
                mod = mod * one_minus_pt
    else:
        mod = one_minus_pt ** jnp.float32(g)
    loss = -mod * log_pt                                   # (1, 1, TL)

    if ragged:
        gidx = h * num_inner + l                           # global pixel-tile index

        # Common-path tiles: no mask work at all.
        @pl.when((gidx + 1) * tl <= hw)
        def _():
            o_ref[...] += loss

        # Tiles that overlap (or lie past) the padded tail carry a lane mask.
        @pl.when((gidx + 1) * tl > hw)
        def _():
            lane = lax.broadcasted_iota(jnp.int32, loss.shape, 2)
            valid = (lane + gidx * tl) < hw
            o_ref[...] += jnp.where(valid, loss, 0.0)
    else:
        o_ref[...] += loss


def _pick_tile_lanes(C, in_bytes, t_bytes, hw, requested=None):
    """Lane-tile size: biggest that fits a conservative VMEM budget, capped at
    8192 lanes (already ~HBM roofline), multiple of 128, capped to the image."""
    if requested is not None:
        tl = int(requested)
    else:
        # Per-lane bytes: 2x double-buffered logits + 2x targets + output +
        # ~4 f32 (C,TL) intermediates.  Budget fits v5e's 16 MiB scoped default.
        budget = 12 * 1024 * 1024
        per_lane = 2 * C * in_bytes + 2 * t_bytes + 4 + 4 * C * 4
        tl = min(budget // per_lane, 8192)
    tl = max(128, (tl // 128) * 128)
    tl = min(tl, pl.cdiv(hw, 128) * 128)
    return int(tl)


def focal_loss(logits, targets, gamma=2.0, reduction="mean", tl=None):
    """logits: (N, C, H, W); targets: (N, H, W) int -> scalar loss."""
    if reduction not in ("mean", "sum"):
        # TODO(synk): reduction='none' (per-pixel loss tensor) not implemented.
        raise NotImplementedError("only 'mean' and 'sum' reductions supported")

    N, C, H, W = logits.shape
    HW = H * W

    # Free reshapes only -- no transpose, no dtype upcast (kernel casts to f32).
    x = logits.reshape(N, C, HW)
    if jnp.issubdtype(targets.dtype, jnp.integer):
        t = targets.reshape(N, 1, HW)          # keep narrow dtype in HBM
    else:
        t = targets.reshape(N, 1, HW).astype(jnp.int32)

    in_bytes = x.dtype.itemsize
    t_bytes = t.dtype.itemsize
    tl = _pick_tile_lanes(C, in_bytes, t_bytes, HW, requested=tl)

    num_l = pl.cdiv(HW, tl)
    # Megacore: when N==1, split the pixel-tile axis in two and mark it
    # parallel so both v7x TensorCores get work (no-op on v5e/v6e).
    n_split = 2 if (N == 1 and num_l >= 2) else 1
    num_inner = pl.cdiv(num_l, n_split)
    HWp = n_split * num_inner * tl
    if HWp != HW:
        x = jnp.pad(x, ((0, 0), (0, 0), (0, HWp - HW)))
        t = jnp.pad(t, ((0, 0), (0, 0), (0, HWp - HW)))
    ragged = HWp != HW

    kernel = functools.partial(
        _focal_loss_kernel, gamma=float(gamma), hw=HW, tl=tl,
        num_inner=num_inner, ragged=ragged)

    # Explicit VMEM limit: working set with headroom, capped for v7x (64 MiB).
    est = (2 * C * in_bytes + 2 * t_bytes + 4 + 4 * C * 4) * tl
    vmem_limit = int(min(48 * 1024 * 1024, max(16 * 1024 * 1024, 2 * est)))

    partials = pl.pallas_call(
        kernel,
        out_shape=jax.ShapeDtypeStruct((N, n_split, tl), jnp.float32),
        grid_spec=pltpu.PrefetchScalarGridSpec(
            num_scalar_prefetch=0,
            grid=(N, n_split, num_inner),
            in_specs=[
                pl.BlockSpec((1, C, tl), lambda n, h, l: (n, 0, h * num_inner + l)),
                pl.BlockSpec((1, 1, tl), lambda n, h, l: (n, 0, h * num_inner + l)),
            ],
            out_specs=pl.BlockSpec((1, 1, tl), lambda n, h, l: (n, h, 0)),
        ),
        compiler_params=pltpu.CompilerParams(
            dimension_semantics=("parallel", "parallel", "arbitrary"),
            vmem_limit_bytes=vmem_limit),
    )(x, t)

    total = jnp.sum(partials)                 # tiny (N * n_split * tl) XLA reduction
    if reduction == "mean":
        return total / jnp.float32(N * HW)
    return total


def _focal_loss_ref(logits, targets, gamma=2.0):
    """Pure-JAX reference mirroring the PyTorch module (reduction='mean')."""
    logp = jax.nn.log_softmax(logits.astype(jnp.float32), axis=1)
    p = jnp.exp(logp)
    tt = targets[:, None, :, :].astype(jnp.int32)
    log_pt = jnp.take_along_axis(logp, tt, axis=1)
    pt = jnp.take_along_axis(p, tt, axis=1)
    loss = -((1.0 - pt) ** gamma) * log_pt
    return loss.mean()


if __name__ == "__main__":
    key = jax.random.PRNGKey(0)
    k1, k2 = jax.random.split(key)
    N, C, H, W = 2, 4, 16, 16
    logits = jax.random.normal(k1, (N, C, H, W), dtype=jnp.float32)
    targets = jax.random.randint(k2, (N, H, W), 0, C, dtype=jnp.int32)

    out = focal_loss(logits, targets, gamma=2.0, reduction="mean")
    out = jax.block_until_ready(out)

    ref = _focal_loss_ref(logits, targets, gamma=2.0)
    assert jnp.allclose(out, ref, rtol=1e-5, atol=1e-6), (out, ref)
    print("KERNEL_OK")
</pallas_src>

<mosaic_0001>
module attributes {stable_mosaic.version = 11 : i64} {
  func.func @_focal_loss_kernel(%arg0: i32, %arg1: i32, %arg2: i32, %arg3: memref<1x4x256xf32, #tpu.memory_space<vmem>>, %arg4: memref<1x1x256xi32, #tpu.memory_space<vmem>>, %arg5: memref<1x1x256xf32, #tpu.memory_space<vmem>>) attributes {dimension_semantics = [#tpu.dimension_semantics<parallel>, #tpu.dimension_semantics<parallel>, #tpu.dimension_semantics<arbitrary>], iteration_bounds = array<i64: 2, 1, 1>, scalar_prefetch = 0 : i64, scratch_operands = 0 : i64, tpu.core_type = #tpu.core_type<tc>, window_params = [{transform_indices = @transform_0, window_bounds = array<i64: 1, 4, 256>}, {transform_indices = @transform_1, window_bounds = array<i64: 1, 1, 256>}, {transform_indices = @transform_2, window_bounds = array<i64: 1, 1, 256>}]} {
    %c0_i32 = arith.constant 0 : i32
    %0 = arith.cmpi eq, %arg2, %c0_i32 : i32
    %1 = arith.extui %0 : i1 to i32
    %c0_i32_0 = arith.constant 0 : i32
    %2 = arith.cmpi ne, %1, %c0_i32_0 : i32
    scf.if %2 {
      %cst_17 = arith.constant 0.000000e+00 : f32
      %32 = vector.broadcast %cst_17 : f32 to vector<1x1x256xf32>
      %c0_18 = arith.constant 0 : index
      %c0_19 = arith.constant 0 : index
      %c0_20 = arith.constant 0 : index
      %33 = vector.load %arg5[%c0_18, %c0_19, %c0_20] : memref<1x1x256xf32, #tpu.memory_space<vmem>>, vector<1x1x256xf32>
      tpu.vector_store %arg5[%c0_18, %c0_19, %c0_20], %32 {strides = array<i32>} : memref<1x1x256xf32, #tpu.memory_space<vmem>>, vector<1x1x256xf32>,
    } else {
    }
    %c0 = arith.constant 0 : index
    %c0_1 = arith.constant 0 : index
    %c0_2 = arith.constant 0 : index
    %3 = vector.load %arg3[%c0, %c0_1, %c0_2] : memref<1x4x256xf32, #tpu.memory_space<vmem>>, vector<1x4x256xf32>
    %c0_3 = arith.constant 0 : index
    %c0_4 = arith.constant 0 : index
    %c0_5 = arith.constant 0 : index
    %4 = vector.load %arg4[%c0_3, %c0_4, %c0_5] : memref<1x1x256xi32, #tpu.memory_space<vmem>>, vector<1x1x256xi32>
    %cst = arith.constant dense<0xFF800000> : vector<1x256xf32>
    %5 = vector.multi_reduction <maximumf>, %3, %cst [1] : vector<1x4x256xf32> to vector<1x256xf32>
    %6 = vector.shape_cast %5 : vector<1x256xf32> to vector<1x1x256xf32>
    %7 = vector.broadcast %6 : vector<1x1x256xf32> to vector<1x4x256xf32>
    %8 = arith.subf %3, %7 : vector<1x4x256xf32>
    %9 = math.exp %8 : vector<1x4x256xf32>
    %cst_6 = arith.constant dense<0.000000e+00> : vector<1x256xf32>
    %10 = vector.multi_reduction <add>, %9, %cst_6 [1] : vector<1x4x256xf32> to vector<1x256xf32>
    %11 = vector.shape_cast %10 : vector<1x256xf32> to vector<1x1x256xf32>
    %12 = tpu.iota {dimensions = array<i32: 1>} : vector<1x4x1xi32>
    %13 = vector.broadcast %12 : vector<1x4x1xi32> to vector<1x4x256xi32>
    %14 = vector.broadcast %4 : vector<1x1x256xi32> to vector<1x4x256xi32>
    %15 = arith.cmpi eq, %13, %14 : vector<1x4x256xi32>
    %cst_7 = arith.constant 0.000000e+00 : f32
    %16 = vector.broadcast %cst_7 : f32 to vector<1x4x256xf32>
    %17 = arith.select %15, %8, %16 : vector<1x4x256xi1>, vector<1x4x256xf32>
    %cst_8 = arith.constant dense<0.000000e+00> : vector<1x256xf32>
    %18 = vector.multi_reduction <add>, %17, %cst_8 [1] : vector<1x4x256xf32> to vector<1x256xf32>
    %19 = vector.shape_cast %18 : vector<1x256xf32> to vector<1x1x256xf32>
    %20 = math.log %11 : vector<1x1x256xf32>
    %21 = arith.subf %19, %20 : vector<1x1x256xf32>
    %22 = math.exp %21 : vector<1x1x256xf32>
    %cst_9 = arith.constant 1.000000e+00 : f32
    %23 = vector.broadcast %cst_9 : f32 to vector<1x1x256xf32>
    %24 = arith.subf %23, %22 : vector<1x1x256xf32>
    %25 = arith.mulf %24, %24 : vector<1x1x256xf32>
    %cst_10 = arith.constant 0.000000e+00 : f32
    %26 = vector.broadcast %cst_10 : f32 to vector<1x1x256xf32>
    %27 = arith.subf %26, %25 : vector<1x1x256xf32>
    %28 = arith.mulf %27, %21 : vector<1x1x256xf32>
    %c0_11 = arith.constant 0 : index
    %c0_12 = arith.constant 0 : index
    %c0_13 = arith.constant 0 : index
    %29 = vector.load %arg5[%c0_11, %c0_12, %c0_13] : memref<1x1x256xf32, #tpu.memory_space<vmem>>, vector<1x1x256xf32>
    %30 = arith.addf %29, %28 : vector<1x1x256xf32>
    %c0_14 = arith.constant 0 : index
    %c0_15 = arith.constant 0 : index
    %c0_16 = arith.constant 0 : index
    %31 = vector.load %arg5[%c0_14, %c0_15, %c0_16] : memref<1x1x256xf32, #tpu.memory_space<vmem>>, vector<1x1x256xf32>
    tpu.vector_store %arg5[%c0_14, %c0_15, %c0_16], %30 {strides = array<i32>} : memref<1x1x256xf32, #tpu.memory_space<vmem>>, vector<1x1x256xf32>,
    return
  }
  func.func @transform_0(%arg0: i32, %arg1: i32, %arg2: i32) -> (i32, i32, i32) {
    %c1_i32 = arith.constant 1 : i32
    %0 = arith.muli %arg1, %c1_i32 : i32
    %1 = arith.addi %0, %arg2 : i32
    %c0_i32 = arith.constant 0 : i32
    %c0_i32_0 = arith.constant 0 : i32
    return %arg0, %c0_i32, %1 : i32, i32, i32
  }
  func.func @transform_1(%arg0: i32, %arg1: i32, %arg2: i32) -> (i32, i32, i32) {
    %c1_i32 = arith.constant 1 : i32
    %0 = arith.muli %arg1, %c1_i32 : i32
    %1 = arith.addi %0, %arg2 : i32
    %c0_i32 = arith.constant 0 : i32
    %c0_i32_0 = arith.constant 0 : i32
    return %arg0, %c0_i32, %1 : i32, i32, i32
  }
  func.func @transform_2(%arg0: i32, %arg1: i32, %arg2: i32) -> (i32, i32, i32) {
    %c0_i32 = arith.constant 0 : i32
    %c0_i32_0 = arith.constant 0 : i32
    return %arg0, %arg1, %c0_i32 : i32, i32, i32
  }
}

</mosaic_0001>

<bundles_post_ra>
// kernel: tpu_custom_call.1
= control target key start
LH: loop header
LB: loop body
LE: loop exit
PB: predicated region body
PF: predicated region fallthrough
CT: control target
= control target key end

     0   :  { %7 = vsyncpa [#allocation3], 0  ;;  %s912_s0 = inlined_call_operand.hbm [shape: f32[2,4,256], index: 0, kind: input, shape index: {}]   ;;  %s913_s1 = inlined_call_operand.hbm [shape: s32[2,1,256], index: 1, kind: input, shape index: {}]   ;;  %s914_s2 = inlined_call_operand.hbm [shape: f32[2,1,256], index: 2, kind: output, shape index: {}]  }
   0x1   :  { %9 = vsyncpa [#allocation3 + $0x1], 0 }
   0x2   :  { %10 = vsyncpa [#allocation6], 0 }
   0x3   :  { %12 = vsyncpa [#allocation6 + $0x1], 0 }
   0x4   :  { %13 = vsyncpa [#allocation4], 0 }
   0x5   :  { %15 = vsyncpa [#allocation4 + $0x1], 0  ;;  %s750_s9 = smov 0   ;;  %s752_s10 = smov 0  }
   0x6   :  { %s754_s11 = smov 0   ;;  %s756_s12 = smov 0  }
   0x7   :  { %s758_s13 = smov 0   ;;  %s760_s14 = smov 0  }
   0x8 LB: > { %s490_s15 = sadd.s32 4294967295, %s732_s14   ;;  %s491_s16 = sadd.s32 4294967294, %s732_s14   ;;  %s732_s14 = sphi %s760_s14, %s21_s14   ;;  %s728_s13 = sphi %s758_s13, %s926_s13   ;;  %s724_s12 = sphi %s756_s12, %s925_s12   ;;  %s720_s11 = sphi %s754_s11, %s924_s11   ;;  %s716_s10 = sphi %s752_s10, %s923_s10   ;;  %s712_s9 = sphi %s750_s9, %s922_s9  }
   0x9   : > { %s40_s17 = sadd.s32 1, %s728_s13  ;;  %s51_s18 = sadd.s32 1, %s720_s11 }
   0xa   : > { %p42_p0 = scmp.ge.s32.totalorder %s40_s17, 2  ;;  %p58_p1 = scmp.ne.s32.totalorder %s720_s11, %s716_s10 }
   0xb   : > { %p59_p2 = scmp.eq.s32.totalorder %s732_s14, 0  ;;  %p64_p3 = scmp.ne.s32.totalorder %s716_s10, %s712_s9 }
   0xc   : > { %s928_s17 = smov (%p42_p0, %s40_s17), 0  ;;  %p65_p5 = scmp.eq.s32.totalorder %s490_s15, 0 }
   0xd   : > { %p791_p4 = por %p59_p2, %p58_p1  ;;  %s46_s20 = ssub.s32 %s728_s13, %s928_s17 }
   0xe   : > { %p120_p6 = scmp.eq.s32.totalorder %s490_s15, 1  ;;  %p49_p7 = scmp.eq.s32.totalorder %s46_s20, 0 }
   0xf   : > { %p797_p8 = por %p65_p5, %p64_p3  ;;  %p126_p10 = scmp.eq.s32.totalorder %s491_s16, 1 }
  0x10   : > { %p801_p9 = por %p120_p6, %p58_p1  ;;  %p493_p12 = scmp.ge.s32.totalorder %s732_s14, 2 }
  0x11   : > { %s806_s23 = scalar_select %p49_p7, %s720_s11, %s51_s18  }
  0x12   : > { %p808_p11 = por %p126_p10, %p64_p3  ;;  %p525_p13 = scmp.lt.s32.totalorder %s732_s14, 2 }
  0x13   : > { %s146_s25 = sand.u32 1, %s720_s11   ;;  %s507_s27 = sshll.u32 %s728_s13, 3 }
  0x14   : > { %s494_s26 = sshll.u32 %s146_s25, 3  ;;  %s158_s30 = scalar_lea.hbm %s912_s0, %s507_s27 }
  0x15   : > { %s150_s3 = scalar_lea.vmem [#allocation2], %s494_s26  ;;  %s160_s5 = sshll.u32 %s158_s30, 4  ;;  %s161_s5 = int_to_ptr.hbm [resolvable:$true] %s160_s5 }
  0x16   : > { %s162_s4 = sshll.u32 %s150_s3, 4  ;;  %p821_p0 = pnand %p525_p13, %p791_p4  ;;  %s163_s4 = int_to_ptr.vmem [resolvable:$true] %s162_s4 }
  0x17   : > { %p499_p1 = scmp.ge.s32.totalorder %s732_s14, 1  ;;  %p189_p2 = scmp.lt.s32.totalorder %s732_s14, 3 }
  0x18   : > { %s147_s7 = scalar_lea.sflag [#allocation3], %s146_s25  ;;  %s497_s8 = sshll.u32 %s146_s25, 1 }
  0x19   : > { %517 = dma.hbm_to_vmem [thread:$0]  (!%p821_p0), %s161_s5, 128, %s163_s4, %s147_s7  }
  0x1a   : > { %p190_p3 = pnand %p499_p1, %p189_p2  ;;  %s498_s15 = sshll.u32 %s728_s13, 1 }
  0x1b   : > { %s180_s20 = scalar_lea.hbm %s913_s1, %s498_s15  ;;  %s173_s26 = scalar_lea.vmem [#allocation5], %s497_s8 }
  0x1c   : > { %s184_s19 = sshll.u32 %s173_s26, 4  ;;  %s182_s27 = sshll.u32 %s180_s20, 4  ;;  %s185_s19 = int_to_ptr.vmem [resolvable:$true] %s184_s19  ;;  %s183_s27 = int_to_ptr.hbm [resolvable:$true] %s182_s27 }
  0x1d   : > { %s170_s28 = scalar_lea.sflag [#allocation6], %s146_s25  ;;  %193 = sbr.rel (%p190_p3) target bundleno = 132 (0x84), region = 28 }
  0x1e   : > { %520 = dma.hbm_to_vmem [thread:$0]  (!%p821_p0), %s183_s27, 32, %s185_s19, %s170_s28  }
  0x1f   : > { %s836_s29 = sand.u32 (!%p190_p3), 1, %s716_s10  }
  0x20   : > { %s500_s30 = sshll.u32 (!%p190_p3), %s836_s29, 3  ;;  %s196_s3 = scalar_lea.sflag (!%p190_p3), [#allocation3], %s836_s29 }
  0x21   : > { %s199_s4 = scalar_lea.vmem (!%p190_p3), [#allocation2], %s500_s30 }
  0x22   : > { %699 = dma.done.wait (%p797_p8), %s196_s3, 128  }
  0x23   : > { %701 = vsyncadd (%p797_p8), %s196_s3, 4294967168  ;;  %s501_s25 = sshll.u32 %s836_s29, 1  ;;  %s206_s5 = scalar_lea.sflag [#allocation6], %s836_s29 }
  0x24   : > { %s846_s6 = scalar_lea.vmem [#allocation5], %s501_s25 }
  0x25   : > { %703 = dma.done.wait (%p797_p8), %s206_s5, 32  }
  0x26   : > { %705 = vsyncadd (%p797_p8), %s206_s5, 4294967264  ;;  %v249_v0 = vld [vmem:[%s199_s4] sm:$0xff]  ;;  %vm257_vm0 = vcmask 1043456   ;;  %v244_v19 = vlaneseq  ;;  %s859_s21 = scalar_lea.vmem [#allocation7], %s501_s25  ;;  %v734_v23 = vmov 0.0   ;;  %s504_s7 = sshll.u32 %s724_s12, 1 }
  0x27   : > { %252 = vst [vmem:[#allocation1] ss:$2 sm:$0xff] %v249_v0  ;;  %v250_v25 = vld [vmem:[%s846_s6] sm:$0x3]  ;;  %s372_s16 = scalar_lea.hbm %s914_s2, %s504_s7  ;;  %vm350_vm4 = vcmask 1040384   ;;  %s374_s18 = sshll.u32 %s859_s21, 4  ;;  %s375_s18 = int_to_ptr.vmem [resolvable:$true] %s374_s18 }
  0x28   : > { %vm855_vm1 = vcmp.lt.s32.totalorder %v244_v19, 256  ;;  %v301_v30 = vshrl.u32 %v244_v19, 7  ;;  %v302_v33 = vperm.slane %v250_v25, 0  ;;  %v303_v34 = vperm.slane %v250_v25, 1  ;;  %s376_s20 = sshll.u32 %s372_s16, 4  ;;  %s360_s12 = scalar_lea.sflag [#allocation4], %s836_s29  ;;  %s377_s20 = int_to_ptr.hbm [resolvable:$true] %s376_s20 }
  0x29   : > { %248 = vst.msk [vmem:[%s859_s21] sm:$0x3] %vm855_vm1, %v734_v23  ;;  %s660_s26 = sshra.s32 %s377_s20, 4  ;;  %s666_s30 = scalar_lea.hbm %s914_s2, 4  ;;  %s661_s26 = int_to_ptr.hbm [resolvable:$true] %s660_s26 }
  0x2a   : > { %vm304_vm2 = vcmp.eq.s32.totalorder %v301_v30, %v302_v33  ;;  %vm305_vm3 = vcmp.eq.s32.totalorder %v301_v30, %v303_v34  ;;  %s662_s19 = scalar_lea.hbm %s661_s26, 2  ;;  %p667_p7 = scmp.lt.s32.totalorder %s661_s26, %s914_s2 }
  0x2b   : > { %p663_p4 = scmp.ne.s32.totalorder %s661_s26, %s662_s19  ;;  %p668_p8 = scmp.lt.s32.totalorder %s666_s30, %s662_s19 }
  0x2d   : > { %p664_p5 = pnand %p663_p4, %p801_p9  ;;  %p669_p10 = por %p668_p8, %p667_p7 }
  0x2e   : > { %v253_v1 = vld.sshfl [vmem:[#allocation1] sm:$0xff pattern:$0x75316420]  ;;  %v254_v2 = vld.sshfl [vmem:[#allocation1 + $0x8] sm:$0xff pattern:$0x75316420] }
  0x2f   : > { %v258_v3 = vsel %vm257_vm0, %v253_v1, -inf  ;;  %v265_v4 = vsel %vm257_vm0, %v254_v2, -inf  ;;  %p665_p6 = pneg %p664_p5 }
  0x30   : > { %v259_v5 = vrot.slane %v258_v3, 4  ;;  %v266_v6 = vrot.slane %v265_v4, 4 }
  0x31   : > { %p670_p13 = pnand %p669_p10, %p665_p6 }
  0x32   : > { %v260_v7 = vmax.f32 %v258_v3, %v259_v5  ;;  %v267_v8 = vmax.f32 %v265_v4, %v266_v6 }
  0x34   : > { %v261_v9 = vrot.slane %v260_v7, 2  ;;  %v268_v10 = vrot.slane %v267_v8, 2 }
  0x36   : > { %v262_v11 = vmax.f32 %v260_v7, %v261_v9  ;;  %v269_v12 = vmax.f32 %v267_v8, %v268_v10 }
  0x38   : > { %v263_v13 = vrot.slane %v262_v11, 1  ;;  %v270_v14 = vrot.slane %v269_v12, 1 }
  0x3a   : > { %v271_v15 = vmax.f32 %v269_v12, %v270_v14  ;;  %v264_v16 = vmax.f32 %v262_v11, %v263_v13 }
  0x3c   : > { %v274_v17 = vrot.slane %v271_v15, 4 }
  0x3e   : > { %v275_v18 = vsel %vm257_vm0, %v264_v16, %v274_v17  ;;  %v346_v17 = vld [vmem:[%s859_s21] sm:$0x3] }
  0x3f   : > { %v277_v20 = vsub.f32 %v249_v0, %v275_v18 }
  0x41   : > { %v278_v22 = vmul.f32 1.442695, %v277_v20 }
  0x43   : > { %576 = vpow2.f32 %v278_v22 }
  0x49   : > { %v577_v24 = vpop.eup %576 }
  0x4a   : > { %281 = vst [vmem:[#allocation1] ss:$2 sm:$0xff] %v577_v24 }
  0x51   : > { %v282_v26 = vld.sshfl [vmem:[#allocation1] sm:$0xff pattern:$0x75316420]  ;;  %v283_v27 = vld.sshfl [vmem:[#allocation1 + $0x8] sm:$0xff pattern:$0x75316420] }
  0x52   : > { %v286_v28 = vsel %vm257_vm0, %v282_v26, 0.0  ;;  %v293_v29 = vsel %vm257_vm0, %v283_v27, 0.0  ;;  %307 = vst [vmem:[#allocation1] ss:$2 sm:$0xff] %v277_v20 }
  0x53   : > { %v287_v31 = vrot.slane %v286_v28, 4  ;;  %v294_v32 = vrot.slane %v293_v29, 4 }
  0x55   : > { %v288_v35 = vadd.f32 %v287_v31, %v286_v28  ;;  %v295_v36 = vadd.f32 %v294_v32, %v293_v29 }
  0x57   : > { %v289_v37 = vrot.slane %v288_v35, 2  ;;  %v296_v38 = vrot.slane %v295_v36, 2 }
  0x59   : > { %v290_v39 = vadd.f32 %v289_v37, %v288_v35  ;;  %v297_v40 = vadd.f32 %v296_v38, %v295_v36  ;;  %v308_v41 = vld.sshfl [vmem:[#allocation1] sm:$0xff pattern:$0x75316420]  ;;  %v309_v42 = vld.sshfl [vmem:[#allocation1 + $0x8] sm:$0xff pattern:$0x75316420] }
  0x5a   : > { %v312_v43 = vsel %vm304_vm2, %v308_v41, 0.0  ;;  %v313_v44 = vsel %vm305_vm3, %v309_v42, 0.0 }
  0x5b   : > { %v291_v45 = vrot.slane %v290_v39, 1  ;;  %v298_v46 = vrot.slane %v297_v40, 1  ;;  %v314_v47 = vsel %vm257_vm0, %v312_v43, 0.0  ;;  %v321_v48 = vsel %vm257_vm0, %v313_v44, 0.0 }
  0x5c   : > { %v315_v49 = vrot.slane %v314_v47, 4  ;;  %v322_v50 = vrot.slane %v321_v48, 4 }
  0x5d   : > { %v292_v51 = vadd.f32 %v291_v45, %v290_v39  ;;  %v299_v52 = vadd.f32 %v298_v46, %v297_v40 }
  0x5e   : > { %v316_v53 = vadd.f32 %v315_v49, %v314_v47  ;;  %v323_v54 = vadd.f32 %v322_v50, %v321_v48 }
  0x5f   : > { %578 = vlog2.f32 %v292_v51 }
  0x60   : > { %580 = vlog2.f32 %v299_v52  ;;  %v317_v55 = vrot.slane %v316_v53, 2  ;;  %v324_v56 = vrot.slane %v323_v54, 2 }
  0x62   : > { %v318_v57 = vadd.f32 %v317_v55, %v316_v53  ;;  %v325_v58 = vadd.f32 %v324_v56, %v323_v54 }
  0x64   : > { %v319_v59 = vrot.slane %v318_v57, 1  ;;  %v326_v60 = vrot.slane %v325_v58, 1 }
  0x65   : > { %v579_v61 = vpop.eup %578 }
  0x66   : > { %v581_v62 = vpop.eup %580  ;;  %v320_v63 = vadd.f32 %v319_v59, %v318_v57  ;;  %v327_v0 = vadd.f32 %v326_v60, %v325_v58  ;;  %v329_v1 = vmul.f32 0.6931472, %v579_v61 }
  0x67   : > { %v331_v2 = vmul.f32 0.6931472, %v581_v62 }
  0x68   : > { %v332_v3 = vsub.f32 %v320_v63, %v329_v1 }
  0x69   : > { %v333_v4 = vsub.f32 %v327_v0, %v331_v2 }
  0x6a   : > { %v334_v5 = vmul.f32 1.442695, %v332_v3 }
  0x6b   : > { %v336_v6 = vmul.f32 1.442695, %v333_v4 }
  0x6c   : > { %582 = vpow2.f32 %v334_v5 }
  0x6d   : > { %584 = vpow2.f32 %v336_v6 }
  0x72   : > { %v583_v7 = vpop.eup %582 }
  0x73   : > { %v585_v8 = vpop.eup %584  ;;  %v338_v9 = vsub.f32 1.0, %v583_v7 }
  0x74   : > { %v339_v10 = vsub.f32 1.0, %v585_v8 }
  0x75   : > { %v340_v11 = vmul.f32 %v338_v9, %v338_v9 }
  0x76   : > { %v341_v12 = vmul.f32 %v339_v10, %v339_v10 }
  0x77   : > { %v342_v13 = vsub.f32 0.0, %v340_v11 }
  0x78   : > { %v343_v14 = vsub.f32 0.0, %v341_v12 }
  0x79   : > { %v344_v16 = vmul.f32 %v342_v13, %v332_v3 }
  0x7a   : > { %v345_v15 = vmul.f32 %v343_v14, %v333_v4 }
  0x7c   : > { %v349_v18 = vrot.slane %v345_v15, 7 }
  0x7e   : > { %v351_v19 = vsel %vm350_vm4, %v344_v16, %v349_v18 }
  0x7f   : > { %v353_v20 = vadd.f32 %v351_v19, %v346_v17 }
  0x81   : > { %358 = vst.msk [vmem:[%s859_s21] sm:$0x3] %vm855_vm1, %v353_v20 }
  0x82   : > { %673 = shalt.err (!%p670_p13)
}
  0x83   : > { %512 = dma.vmem_to_hbm [thread:$0]  (%p801_p9), %s375_s18, 32, %s377_s20, %s360_s12  }
  0x84 PF: > { %s388_s29 = sand.u32 1, %s712_s9   ;;  %p522_p0 = pnand %p493_p12, %p808_p11 }
  0x85   : > { %s389_s25 = scalar_lea.sflag [#allocation4], %s388_s29 }
  0x86   : > { %p523_p1 = pneg %p522_p0 }
  0x88   : > { %707 = dma.done.wait (%p523_p1), %s389_s25, 32  }
  0x89   : > { %709 = vsyncadd (%p523_p1), %s389_s25, 4294967264  ;;  %s21_s14 = sadd.s32 1, %s732_s14   ;;  %s922_s9 = smov %s716_s10 }
  0x8a   : > { %p18_p2 = scmp.ge.s32.totalorder %s21_s14, 4   ;;  %s923_s10 = smov %s720_s11 }
  0x8b   : > { %s924_s11 = smov %s806_s23  ;;  %s925_s12 = smov %s728_s13 }
  0x8c   : > { %s926_s13 = smov %s928_s17  ;;  %20 = sbr.rel (!%p18_p2) target bundleno = 8 (0x8), region = 90 }
  0x91   :  { %395 = vsyncpa [#allocation3], 1 }
  0x92   :  { %397 = vsyncpa [#allocation3 + $0x1], 1 }
  0x93   :  { %398 = vsyncpa [#allocation6], 1 }
  0x94   :  { %400 = vsyncpa [#allocation6 + $0x1], 1 }
  0x95   :  { %401 = vsyncpa [#allocation4], 1 }
  0x96   :  { %403 = vsyncpa [#allocation4 + $0x1], 1 }

</bundles_post_ra>
